<compile_context>
chip_gen: v6e
topology: v6e:2x2x1
jax: 0.10.0
libtpu: 0.0.40
codegen_flags: <defaults>
</compile_context>

<pallas_src>
import jax
import jax.numpy as jnp
from jax import lax
from jax.experimental import pallas as pl
from jax.experimental.pallas import tpu as pltpu

_LANES = 128
_SUBLANES = 8
_MAX_TILE_ROWS = 2048       # (2048, 128) f32 block = 1 MiB per input per buffer


def _round_up(x, m):
    return ((x + m - 1) // m) * m


def _pack_2d(x):
    """Flatten -> pad -> (rows, 128) with rows = tile_rows * num_tiles.

    Returns (packed_2d, true_elem_count, tile_rows, num_tiles)."""
    flat = x.reshape(-1)
    n = flat.size
    rows = _round_up(pl.cdiv(n, _LANES), _SUBLANES)
    nt = pl.cdiv(rows, _MAX_TILE_ROWS)
    tr = _round_up(pl.cdiv(rows, nt), _SUBLANES)     # <= _MAX_TILE_ROWS
    rows_p = tr * nt                                 # minimal padding (< nt*8 rows)
    pad = rows_p * _LANES - n
    if pad:
        flat = jnp.pad(flat, (0, pad))
    return flat.reshape(rows_p, _LANES), n, tr, nt


def _bce_tile(x, t, tile_rows, block_idx, n_true):
    """Per-tile stable BCE-with-logits, masked to true extent, folded to (8,128)."""
    x = x.astype(jnp.float32)
    t = t.astype(jnp.float32)
    # max(x,0) - x*t + log1p(exp(-|x|))
    loss = jnp.maximum(x, 0.0) - x * t + jnp.log1p(jnp.exp(-jnp.abs(x)))
    # Mask padded tail (padded zeros would otherwise contribute log(2) each).
    rows = lax.broadcasted_iota(jnp.int32, (tile_rows, _LANES), 0)
    cols = lax.broadcasted_iota(jnp.int32, (tile_rows, _LANES), 1)
    lin = (block_idx * tile_rows + rows) * _LANES + cols
    loss = jnp.where(lin < n_true, loss, 0.0)
    # Fold extra rows with VPU adds only (single XLU reduce happens at the end).
    return loss.reshape(tile_rows // _SUBLANES, _SUBLANES, _LANES).sum(axis=0)


def _mse_tile(a, b, tile_rows):
    """Per-tile squared error folded to (8,128). Padded zeros contribute 0."""
    d = a.astype(jnp.float32) - b.astype(jnp.float32)
    sq = d * d
    return sq.reshape(tile_rows // _SUBLANES, _SUBLANES, _LANES).sum(axis=0)


def _row_tile_spec(tr, nt, num_tiles):
    if nt == num_tiles:
        return pl.BlockSpec((tr, _LANES), lambda i: (i, 0))
    # Clamp: once this operand's tiles are exhausted, keep pointing at the last
    # (already-resident) block; its compute is skipped via pl.when.
    return pl.BlockSpec((tr, _LANES), lambda i: (jnp.minimum(i, nt - 1), 0))


def _bce_only_call(pred2d, targ2d, n_bce, tr, nt):
    def kernel(p_ref, t_ref, out_ref, acc):
        i = pl.program_id(0)

        @pl.when(i == 0)
        def _init():
            acc[...] = jnp.zeros_like(acc)

        acc[...] += _bce_tile(p_ref[...], t_ref[...], tr, i, n_bce)

        @pl.when(i == nt - 1)
        def _finalize():
            out_ref[0, 0] = jnp.sum(acc[...]) / jnp.float32(n_bce)

    return pl.pallas_call(
        kernel,
        out_shape=jax.ShapeDtypeStruct((1, 1), jnp.float32),
        grid=(nt,),
        in_specs=[pl.BlockSpec((tr, _LANES), lambda i: (i, 0)),
                  pl.BlockSpec((tr, _LANES), lambda i: (i, 0))],
        out_specs=pl.BlockSpec((1, 1), lambda i: (0, 0),
                               memory_space=pltpu.SMEM),
        scratch_shapes=[pltpu.VMEM((_SUBLANES, _LANES), jnp.float32)],
        compiler_params=pltpu.CompilerParams(
            dimension_semantics=("arbitrary",)),
    )(pred2d, targ2d)[0, 0]


def _fused_call(pred2d, targ2d, rf2d, ff2d,
                n_bce, n_mse, tr_bce, tr_mse, nt_bce, nt_mse, gamma):
    num_tiles = max(nt_bce, nt_mse)

    def kernel(p_ref, t_ref, rf_ref, ff_ref, out_ref, acc_bce, acc_mse):
        i = pl.program_id(0)

        @pl.when(i == 0)
        def _init():
            acc_bce[...] = jnp.zeros_like(acc_bce)
            acc_mse[...] = jnp.zeros_like(acc_mse)

        def _do_bce():
            acc_bce[...] += _bce_tile(p_ref[...], t_ref[...], tr_bce, i, n_bce)

        def _do_mse():
            acc_mse[...] += _mse_tile(rf_ref[...], ff_ref[...], tr_mse)

        if nt_bce == num_tiles:
            _do_bce()
        else:
            pl.when(i < nt_bce)(_do_bce)
        if nt_mse == num_tiles:
            _do_mse()
        else:
            pl.when(i < nt_mse)(_do_mse)

        @pl.when(i == num_tiles - 1)
        def _finalize():
            adv = jnp.sum(acc_bce[...]) / jnp.float32(n_bce)
            fm = jnp.sum(acc_mse[...]) / jnp.float32(n_mse)
            out_ref[0, 0] = adv + jnp.float32(gamma) * fm

    return pl.pallas_call(
        kernel,
        out_shape=jax.ShapeDtypeStruct((1, 1), jnp.float32),
        grid=(num_tiles,),
        in_specs=[_row_tile_spec(tr_bce, nt_bce, num_tiles),
                  _row_tile_spec(tr_bce, nt_bce, num_tiles),
                  _row_tile_spec(tr_mse, nt_mse, num_tiles),
                  _row_tile_spec(tr_mse, nt_mse, num_tiles)],
        out_specs=pl.BlockSpec((1, 1), lambda i: (0, 0),
                               memory_space=pltpu.SMEM),
        scratch_shapes=[pltpu.VMEM((_SUBLANES, _LANES), jnp.float32),
                        pltpu.VMEM((_SUBLANES, _LANES), jnp.float32)],
        compiler_params=pltpu.CompilerParams(
            dimension_semantics=("arbitrary",)),
    )(pred2d, targ2d, rf2d, ff2d)[0, 0]


def custom_gan_loss(predictions, targets, gamma=0.5,
                    real_features=None, fake_features=None):
    """JAX/Pallas equivalent of CustomGANLoss.forward.

    The feature-matching tensors (model.discriminator.get_features outputs in
    PyTorch) are passed in explicitly; when absent, fm_loss == 0."""
    pred2d, n_bce, tr_bce, nt_bce = _pack_2d(predictions)
    targ2d, _, _, _ = _pack_2d(targets)

    if real_features is not None and fake_features is not None:
        rf2d, n_mse, tr_mse, nt_mse = _pack_2d(real_features)
        ff2d, _, _, _ = _pack_2d(fake_features)
        return _fused_call(pred2d, targ2d, rf2d, ff2d,
                           n_bce, n_mse, tr_bce, tr_mse, nt_bce, nt_mse,
                           float(gamma))
    return _bce_only_call(pred2d, targ2d, n_bce, tr_bce, nt_bce)


def _reference(predictions, targets, gamma=0.5,
               real_features=None, fake_features=None):
    x = predictions.astype(jnp.float32)
    t = targets.astype(jnp.float32)
    adv = jnp.mean(jnp.maximum(x, 0.0) - x * t + jnp.log1p(jnp.exp(-jnp.abs(x))))
    if real_features is not None and fake_features is not None:
        fm = jnp.mean((real_features.astype(jnp.float32)
                       - fake_features.astype(jnp.float32)) ** 2)
    else:
        fm = 0.0
    return adv + gamma * fm


if __name__ == "__main__":
    key = jax.random.PRNGKey(0)
    k1, k2, k3, k4, k5, k6 = jax.random.split(key, 6)

    # Discriminator logits / labels and feature-matching tensors (small shapes).
    predictions = jax.random.normal(k1, (8, 128), dtype=jnp.float32)
    targets = (jax.random.uniform(k2, (8, 128)) > 0.5).astype(jnp.float32)
    real_features = jax.random.normal(k3, (8, 128), dtype=jnp.float32)
    fake_features = jax.random.normal(k4, (8, 128), dtype=jnp.float32)

    # Path 1: model=None -> fm_loss = 0 (BCE-only kernel).
    loss_no_fm = jax.block_until_ready(
        custom_gan_loss(predictions, targets, gamma=0.5))
    # Path 2: feature-matching term present (single fused kernel).
    loss_fm = jax.block_until_ready(
        custom_gan_loss(predictions, targets, gamma=0.5,
                        real_features=real_features,
                        fake_features=fake_features))

    ref_no_fm = _reference(predictions, targets, 0.5)
    ref_fm = _reference(predictions, targets, 0.5, real_features, fake_features)
    assert jnp.allclose(loss_no_fm, ref_no_fm, rtol=1e-5, atol=1e-5)
    assert jnp.allclose(loss_fm, ref_fm, rtol=1e-5, atol=1e-5)

    # Ragged / multi-tile check: exercises the tiled accumulator, the
    # padded-tail mask, and the clamped index_map of the smaller operand.
    pred_big = jax.random.normal(k5, (2100, 130), dtype=jnp.float32)
    targ_big = (jax.random.uniform(k6, (2100, 130)) > 0.5).astype(jnp.float32)
    loss_big = jax.block_until_ready(
        custom_gan_loss(pred_big, targ_big, gamma=0.5,
                        real_features=real_features,
                        fake_features=fake_features))
    ref_big = _reference(pred_big, targ_big, 0.5, real_features, fake_features)
    assert jnp.allclose(loss_big, ref_big, rtol=1e-5, atol=1e-5)

    print("KERNEL_OK")
</pallas_src>

<mosaic_0001>
module attributes {stable_mosaic.version = 11 : i64} {
  func.func @kernel(%arg0: i32, %arg1: memref<8x128xf32, #tpu.memory_space<vmem>>, %arg2: memref<8x128xf32, #tpu.memory_space<vmem>>, %arg3: memref<1x1xf32, #tpu.memory_space<smem>>, %arg4: memref<8x128xf32, #tpu.memory_space<vmem>>) attributes {dimension_semantics = [#tpu.dimension_semantics<arbitrary>], iteration_bounds = array<i64: 1>, scalar_prefetch = 0 : i64, scratch_operands = 1 : i64, tpu.core_type = #tpu.core_type<tc>, window_params = [{transform_indices = @transform_0, window_bounds = array<i64: 8, 128>}, {transform_indices = @transform_1, window_bounds = array<i64: 8, 128>}, {transform_indices = @transform_2, window_bounds = array<i64: 1, 1>}]} {
    %c0_i32 = arith.constant 0 : i32
    %0 = arith.cmpi eq, %arg0, %c0_i32 : i32
    %1 = arith.extui %0 : i1 to i32
    %c0_i32_0 = arith.constant 0 : i32
    %2 = arith.cmpi ne, %1, %c0_i32_0 : i32
    scf.if %2 {
      %cst_13 = arith.constant 0.000000e+00 : f32
      %35 = vector.broadcast %cst_13 : f32 to vector<8x128xf32>
      %c0_14 = arith.constant 0 : index
      %c0_15 = arith.constant 0 : index
      %36 = vector.load %arg4[%c0_14, %c0_15] : memref<8x128xf32, #tpu.memory_space<vmem>>, vector<8x128xf32>
      tpu.vector_store %arg4[%c0_14, %c0_15], %35 {strides = array<i32>} : memref<8x128xf32, #tpu.memory_space<vmem>>, vector<8x128xf32>,
    } else {
    }
    %c0 = arith.constant 0 : index
    %c0_1 = arith.constant 0 : index
    %3 = vector.load %arg4[%c0, %c0_1] : memref<8x128xf32, #tpu.memory_space<vmem>>, vector<8x128xf32>
    %c0_2 = arith.constant 0 : index
    %c0_3 = arith.constant 0 : index
    %4 = vector.load %arg1[%c0_2, %c0_3] : memref<8x128xf32, #tpu.memory_space<vmem>>, vector<8x128xf32>
    %c0_4 = arith.constant 0 : index
    %c0_5 = arith.constant 0 : index
    %5 = vector.load %arg2[%c0_4, %c0_5] : memref<8x128xf32, #tpu.memory_space<vmem>>, vector<8x128xf32>
    %cst = arith.constant 0.000000e+00 : f32
    %6 = vector.broadcast %cst : f32 to vector<8x128xf32>
    %7 = arith.maximumf %4, %6 : vector<8x128xf32>
    %8 = arith.mulf %4, %5 : vector<8x128xf32>
    %9 = arith.subf %7, %8 : vector<8x128xf32>
    %10 = math.absf %4 : vector<8x128xf32>
    %cst_6 = arith.constant 0.000000e+00 : f32
    %11 = vector.broadcast %cst_6 : f32 to vector<8x128xf32>
    %12 = arith.subf %11, %10 : vector<8x128xf32>
    %13 = math.exp %12 : vector<8x128xf32>
    %14 = math.log1p %13 : vector<8x128xf32>
    %15 = arith.addf %9, %14 : vector<8x128xf32>
    %16 = tpu.iota {dimensions = array<i32: 0>} : vector<8x128xi32>
    %17 = tpu.iota {dimensions = array<i32: 1>} : vector<8x128xi32>
    %c8_i32 = arith.constant 8 : i32
    %18 = arith.muli %arg0, %c8_i32 : i32
    %19 = vector.broadcast %18 : i32 to vector<8x128xi32>
    %20 = arith.addi %19, %16 : vector<8x128xi32>
    %c128_i32 = arith.constant 128 : i32
    %21 = vector.broadcast %c128_i32 : i32 to vector<8x128xi32>
    %22 = arith.muli %20, %21 : vector<8x128xi32>
    %23 = arith.addi %22, %17 : vector<8x128xi32>
    %c1024_i32 = arith.constant 1024 : i32
    %24 = vector.broadcast %c1024_i32 : i32 to vector<8x128xi32>
    %25 = arith.cmpi slt, %23, %24 : vector<8x128xi32>
    %cst_7 = arith.constant 0.000000e+00 : f32
    %26 = vector.broadcast %cst_7 : f32 to vector<8x128xf32>
    %27 = arith.select %25, %15, %26 : vector<8x128xi1>, vector<8x128xf32>
    %28 = vector.shape_cast %27 : vector<8x128xf32> to vector<1x8x128xf32>
    %cst_8 = arith.constant dense<0.000000e+00> : vector<8x128xf32>
    %29 = vector.multi_reduction <add>, %28, %cst_8 [0] : vector<1x8x128xf32> to vector<8x128xf32>
    %30 = arith.addf %3, %29 : vector<8x128xf32>
    %c0_9 = arith.constant 0 : index
    %c0_10 = arith.constant 0 : index
    %31 = vector.load %arg4[%c0_9, %c0_10] : memref<8x128xf32, #tpu.memory_space<vmem>>, vector<8x128xf32>
    tpu.vector_store %arg4[%c0_9, %c0_10], %30 {strides = array<i32>} : memref<8x128xf32, #tpu.memory_space<vmem>>, vector<8x128xf32>,
    %c0_i32_11 = arith.constant 0 : i32
    %32 = arith.cmpi eq, %arg0, %c0_i32_11 : i32
    %33 = arith.extui %32 : i1 to i32
    %c0_i32_12 = arith.constant 0 : i32
    %34 = arith.cmpi ne, %33, %c0_i32_12 : i32
    scf.if %34 {
      %c0_13 = arith.constant 0 : index
      %c0_14 = arith.constant 0 : index
      %35 = vector.load %arg4[%c0_13, %c0_14] : memref<8x128xf32, #tpu.memory_space<vmem>>, vector<8x128xf32>
      %36 = vector.shape_cast %35 : vector<8x128xf32> to vector<1x8x128xf32>
      %cst_15 = arith.constant dense<0.000000e+00> : vector<1xf32>
      %37 = vector.multi_reduction <add>, %36, %cst_15 [1, 2] : vector<1x8x128xf32> to vector<1xf32>
      %38 = vector.shape_cast %37 : vector<1xf32> to vector<1x1x1xf32>
      %39 = vector.extract %38[0, 0, 0] : f32 from vector<1x1x1xf32>
      %cst_16 = arith.constant 1.024000e+03 : f32
      %40 = arith.divf %39, %cst_16 : f32
      %c0_17 = arith.constant 0 : index
      %c0_18 = arith.constant 0 : index
      %41 = memref.load %arg3[%c0_17, %c0_18] : memref<1x1xf32, #tpu.memory_space<smem>>
      memref.store %40, %arg3[%c0_17, %c0_18] : memref<1x1xf32, #tpu.memory_space<smem>>
    } else {
    }
    return
  }
  func.func @transform_0(%arg0: i32) -> (i32, i32) {
    %c0_i32 = arith.constant 0 : i32
    %c0_i32_0 = arith.constant 0 : i32
    return %arg0, %c0_i32 : i32, i32
  }
  func.func @transform_1(%arg0: i32) -> (i32, i32) {
    %c0_i32 = arith.constant 0 : i32
    %c0_i32_0 = arith.constant 0 : i32
    return %arg0, %c0_i32 : i32, i32
  }
  func.func @transform_2(%arg0: i32) -> (i32, i32) {
    %c0_i32 = arith.constant 0 : i32
    %c0_i32_0 = arith.constant 0 : i32
    %c0_i32_1 = arith.constant 0 : i32
    return %c0_i32, %c0_i32_0 : i32, i32
  }
}

</mosaic_0001>

<bundles_post_ra>
// kernel: tpu_custom_call.1
= control target key start
LH: loop header
LB: loop body
LE: loop exit
PB: predicated region body
PF: predicated region fallthrough
CT: control target
= control target key end

     0   :  { %7 = vsyncpa [#allocation4], 0  ;;  %s198_s0 = inlined_call_operand.hbm [shape: f32[8,128], index: 0, kind: input, shape index: {}]   ;;  %s199_s1 = inlined_call_operand.hbm [shape: f32[8,128], index: 1, kind: input, shape index: {}]   ;;  %s200_s2 = inlined_call_operand.hbm [shape: f32[1,1], index: 2, kind: output, shape index: {}]  }
   0x1   :  { %8 = vsyncpa [#allocation7], 0 }
   0x2   :  { %9 = vsyncpa [#allocation5], 0  ;;  %s171_s9 = smov [#allocation3]   ;;  %s172_s11 = smov [#allocation6]  }
   0x3   :  { %s16_s10 = sshll.u32 %s171_s9, 4  ;;  %s26_s12 = sshll.u32 %s172_s11, 4  ;;  %s17_s10 = int_to_ptr.vmem [resolvable:$true] %s16_s10  ;;  %s27_s12 = int_to_ptr.vmem [resolvable:$true] %s26_s12 }
   0x4   :  { %s125_s13 = scalar_lea.vmem %s17_s10, 128  ;;  %p130_p1 = scmp.lt.s32.totalorder %s17_s10, %s17_s10 }
   0x5   :  { %p126_p0 = scmp.ne.s32.totalorder %s17_s10, %s125_s13  ;;  %p131_p2 = scmp.lt.s32.totalorder %s125_s13, %s125_s13 }
   0x7   :  { %p132_p3 = por %p131_p2, %p130_p1 }
   0x9   :  { %p133_p4 = pnand %p132_p3, %p126_p0 }
   0xb   :  { %136 = shalt.err (!%p133_p4)
}
   0xc   :  { %19 = dma.hbm_to_vmem [thread:$0]  %s198_s0, 128, %s17_s10, [#allocation4]  }
   0xd   :  { %s145_s16 = scalar_lea.vmem %s27_s12, 128  ;;  %p150_p6 = scmp.lt.s32.totalorder %s27_s12, %s27_s12 }
   0xe   :  { %p146_p5 = scmp.ne.s32.totalorder %s27_s12, %s145_s16  ;;  %p151_p7 = scmp.lt.s32.totalorder %s145_s16, %s145_s16 }
  0x10   :  { %p152_p8 = por %p151_p7, %p150_p6 }
  0x12   :  { %p153_p9 = pnand %p152_p8, %p146_p5 }
  0x14   :  { %156 = shalt.err (!%p153_p9)
}
  0x15   :  { %29 = dma.hbm_to_vmem [thread:$0]  %s199_s1, 128, %s27_s12, [#allocation7]  }
  0x16   :  { %165 = dma.done.wait [#allocation4], 128  }
  0x17   :  { %166 = vsyncadd [#allocation4], 4294967168 }
  0x18   :  { %167 = dma.done.wait [#allocation7], 128  }
  0x19   :  { %168 = vsyncadd [#allocation7], 4294967168  ;;  %v42_v0 = vld [vmem:[#allocation3] sm:$0xff]  ;;  %v61_v6 = vlaneseq  ;;  %v43_v9 = vld [vmem:[#allocation6] sm:$0xff]  ;;  %s173_s19 = smov [#allocation8]  }
  0x1a   :  { %v47_v1 = vand.u32 2147483647, %v42_v0  ;;  %v44_v13 = vmax.f32 %v42_v0, 0.0  ;;  %v45_v14 = vmul.f32 %v43_v9, %v42_v0 }
  0x1b   :  { %v62_v8 = vshrl.u32 %v61_v6, 7  ;;  %v64_v11 = vand.u32 127, %v61_v6 }
  0x1c   :  { %v48_v2 = vsub.f32 0.0, %v47_v1  ;;  %v46_v19 = vsub.f32 %v44_v13, %v45_v14 }
  0x1d   :  { %v68_v12 = vmul.u32 128, %v62_v8 }
  0x1e   :  { %v49_v3 = vmul.f32 1.442695, %v48_v2 }
  0x1f   :  { %v69_v17 = vadd.s32 %v68_v12, %v64_v11 }
  0x20   :  { %113 = vpow2.f32 %v49_v3 }
  0x21   :  { %vm70_vm1 = vcmp.lt.s32.totalorder %v69_v17, 1024 }
  0x2d   :  { %v114_v4 = vpop.eup %113 }
  0x2e   :  { %v51_v5 = vadd.f32 1.0, %v114_v4  ;;  %v54_v7 = vmul.f32 -0.5, %v114_v4  ;;  %v57_v15 = vand.u32 2147483647, %v114_v4 }
  0x30   :  { %115 = vlog2.f32 %v51_v5  ;;  %v55_v10 = vadd.f32 1.0, %v54_v7  ;;  %vm58_vm0 = vcmp.lt.f32.partialorder %v57_v15, 0.0004427343 }
  0x32   :  { %v56_v16 = vmul.f32 %v114_v4, %v55_v10 }
  0x3d   :  { %v116_v18 = vpop.eup %115 }
  0x3e   :  { %v53_v20 = vmul.f32 0.6931472, %v116_v18 }
  0x40   :  { %v59_v21 = vsel %vm58_vm0, %v56_v16, %v53_v20 }
  0x41   :  { %v60_v22 = vadd.f32 %v59_v21, %v46_v19 }
  0x43   :  { %v71_v23 = vsel %vm70_vm1, %v60_v22, 0.0 }
  0x44   :  { %79 = vadd.xlane.f32.xlu0 %v71_v23 }
  0xcd   :  { %v80_v24 = vpop.xlane.xlu0 %79 }
  0xce   :  { %v81_v25 = vrot.slane %v80_v24, 4 }
  0xd0   :  { %v82_v26 = vadd.f32 %v81_v25, %v80_v24 }
  0xd2   :  { %v83_v27 = vrot.slane %v82_v26, 2 }
  0xd4   :  { %v84_v28 = vadd.f32 %v83_v27, %v82_v26 }
  0xd6   :  { %v85_v29 = vrot.slane %v84_v28, 1 }
  0xd8   :  { %v86_v30 = vadd.f32 %v85_v29, %v84_v28 }
  0xda   :  { %108 = vpush %v86_v30 }
 0x10b   :  { %s109_s0 = spop %108 }
 0x10c   :  { %s90_s1 = smul.f32 0.0009765625, %s109_s0 }
 0x10e   :  { %92 = sst [smem:[#allocation8]] %s90_s1 }
 0x10f   :  { %100 = dma.smem_to_hbm %s173_s19, 16, %s200_s2, [#allocation5]  }
 0x110   :  { %169 = dma.done.wait [#allocation5], 16  }
 0x111   :  { %170 = vsyncadd [#allocation5], 4294967280 }
 0x112   :  { %104 = sfence }
 0x113   :  { %105 = vsyncpa [#allocation4], 1 }
 0x114   :  { %106 = vsyncpa [#allocation7], 1 }
 0x115   :  { %107 = vsyncpa [#allocation5], 1 }

</bundles_post_ra>
